<compile_context>
chip_gen: v6e
topology: v6e:2x2x1
jax: 0.10.0
libtpu: 0.0.40
codegen_flags: <defaults>
</compile_context>

<pallas_src>
import jax
import jax.numpy as jnp
from jax.experimental import pallas as pl
from jax.experimental.pallas import tpu as pltpu


_NEG_LARGE = -1e30  # bias on padded class lanes -> exp() == 0 under softmax


def _round_up(n: int, m: int) -> int:
    return ((n + m - 1) // m) * m


def perceptron_kernel(x_ref, w1_ref, b1_ref, w2_ref, b2_ref, out_ref):
    # ---- fully_connected_layer: x @ W1 + b1 (bf16 MXU operands, f32 accum) ----
    xb = x_ref[...]
    if xb.dtype != jnp.bfloat16:          # no-op if upstream already emits bf16
        xb = xb.astype(jnp.bfloat16)
    h = jnp.dot(xb, w1_ref[...], preferred_element_type=jnp.float32)
    h = h + b1_ref[...]                   # broadcast add, f32 on VPU
    # ---- ReLU (f32) ----
    h = jnp.maximum(h, 0.0)
    # ---- Dropout(p=0.1): identity in eval mode ----
    # TODO(synk): training-mode dropout (pltpu.prng_seed + prng_random_bits
    #             mask/scale) not emitted; forward matches model.eval().
    # ---- out_layer: h @ W2 + b2 ----
    logits = jnp.dot(h.astype(jnp.bfloat16), w2_ref[...],
                     preferred_element_type=jnp.float32)
    logits = logits + b2_ref[...]         # padded lanes carry -1e30 bias
    # ---- Softmax(dim=1), numerically stable; padded lanes contribute 0 ----
    m = jnp.max(logits, axis=-1, keepdims=True)
    e = jnp.exp(logits - m)
    denom = jnp.sum(e, axis=-1, keepdims=True)
    out_ref[...] = e / denom              # exact normalization: rows sum to 1


def perceptron_forward(x_nchw, w1, b1, w2, b2, *, block_b=512,
                       keep_padded_classes=False):
    """x_nchw: [B, C, H, W] (f32 or bf16). w1: [in, hid], w2: [hid, out].

    Returns softmax probabilities [B, out] float32 (or [B, out_p] padded if
    keep_padded_classes=True; padded lanes are exactly 0).
    """
    B = x_nchw.shape[0]
    x2d = x_nchw.reshape(B, -1)           # torch.flatten(x, 1); keep caller dtype
    in_f, hid = w1.shape
    hid2, out_f = w2.shape
    assert x2d.shape[1] == in_f and hid2 == hid

    # Lane-align hidden and class dims to multiples of 128 (128, not 256: the
    # kernel is HBM-bound, so don't trade bytes for MXU occupancy).
    hid_p = _round_up(hid, 128)
    out_p = _round_up(out_f, 128)

    # bf16 weights (halve HBM bytes); biases stay f32.  Zero-padded hidden
    # columns give ReLU(0)=0; zero-padded W2 rows contribute nothing.
    w1_p = jnp.zeros((in_f, hid_p), jnp.bfloat16).at[:, :hid].set(
        w1.astype(jnp.bfloat16))
    b1_p = jnp.zeros((1, hid_p), jnp.float32).at[:, :hid].set(
        b1.reshape(1, hid).astype(jnp.float32))
    w2_p = jnp.zeros((hid_p, out_p), jnp.bfloat16).at[:hid, :out_f].set(
        w2.astype(jnp.bfloat16))
    b2_p = jnp.full((1, out_p), _NEG_LARGE, jnp.float32).at[:, :out_f].set(
        b2.reshape(1, out_f).astype(jnp.float32))

    # Batch tile: largest aligned tile <= block_b, but with >= 2 grid steps
    # whenever B >= 16 so both v7x TensorCores get a share of the batch.
    itemsize = jnp.dtype(x2d.dtype).itemsize
    align = 16 if x2d.dtype == jnp.bfloat16 else 8
    if B >= 16:
        tb = min(block_b, _round_up(-(-B // 2), align))
    else:
        tb = min(block_b, _round_up(B, align))
    tb = _round_up(tb, align)
    Bp = _round_up(B, tb)
    if Bp != B:
        x2d = jnp.zeros((Bp, in_f), x2d.dtype).at[:B].set(x2d)
    grid = (Bp // tb,)

    # VMEM budget: double-buffered x/out tiles + single-buffered resident
    # weights.  Explicit limit so v5e's 16 MiB default scoped VMEM doesn't
    # force a smaller internal tiling; capped below v7x's 64 MiB physical.
    vmem_need = (2 * tb * in_f * itemsize            # x tiles (2 buffers)
                 + 2 * tb * out_p * 4                # out tiles (2 buffers)
                 + (in_f * hid_p + hid_p * out_p) * 2  # bf16 weights (1 buffer)
                 + (hid_p + out_p) * 4)              # biases
    vmem_limit = int(min(max(int(vmem_need * 1.5) + (4 << 20), 16 << 20),
                         48 << 20))

    flops = 2 * Bp * (in_f * hid_p + hid_p * out_p)
    bytes_accessed = (Bp * in_f * itemsize + w1_p.size * 2 + w2_p.size * 2
                      + b1_p.size * 4 + b2_p.size * 4 + Bp * out_p * 4)
    cost = pl.CostEstimate(flops=flops,
                           transcendentals=Bp * out_p,
                           bytes_accessed=bytes_accessed)

    resident = dict(pipeline_mode=pl.Buffered(1))  # constant index_map -> 1 buffer

    out = pl.pallas_call(
        perceptron_kernel,
        out_shape=jax.ShapeDtypeStruct((Bp, out_p), jnp.float32),
        grid=grid,
        in_specs=[
            pl.BlockSpec((tb, in_f),     lambda i: (i, 0)),   # x: pipelined per tile
            pl.BlockSpec((in_f, hid_p),  lambda i: (0, 0), **resident),
            pl.BlockSpec((1, hid_p),     lambda i: (0, 0), **resident),
            pl.BlockSpec((hid_p, out_p), lambda i: (0, 0), **resident),
            pl.BlockSpec((1, out_p),     lambda i: (0, 0), **resident),
        ],
        out_specs=pl.BlockSpec((tb, out_p), lambda i: (i, 0)),
        compiler_params=pltpu.CompilerParams(
            dimension_semantics=("parallel",),   # batch tiles independent
            vmem_limit_bytes=vmem_limit),
        cost_estimate=cost,
    )(x2d, w1_p, b1_p, w2_p, b2_p)

    if keep_padded_classes:
        return out if Bp == B else out[:B]
    return out[:B, :out_f]


def init_params(key, input_size, hidden_size, output_size):
    """Deterministic init mimicking torch.nn.Linear (U[-1/sqrt(fan_in), ...]).

    Weights stored transposed vs. PyTorch ([in, out]) so the kernel does x @ W.
    """
    k1, k2, k3, k4 = jax.random.split(key, 4)
    bound1 = 1.0 / jnp.sqrt(input_size)
    bound2 = 1.0 / jnp.sqrt(hidden_size)
    w1 = jax.random.uniform(k1, (input_size, hidden_size), jnp.float32,
                            -bound1, bound1)
    b1 = jax.random.uniform(k2, (1, hidden_size), jnp.float32, -bound1, bound1)
    w2 = jax.random.uniform(k3, (hidden_size, output_size), jnp.float32,
                            -bound2, bound2)
    b2 = jax.random.uniform(k4, (1, output_size), jnp.float32, -bound2, bound2)
    return w1, b1, w2, b2


if __name__ == "__main__":
    # Small shapes consistent with the module: NCHW image flattened to
    # input_size = C*H*W; hidden layer; 100-way CIFAR100-style output.
    B, C, H, W = 8, 4, 16, 16
    input_size = C * H * W      # 1024
    hidden_size = 128
    output_size = 100

    key = jax.random.PRNGKey(0)
    kx, kp = jax.random.split(key)
    x = jax.random.normal(kx, (B, C, H, W), jnp.float32)
    w1, b1, w2, b2 = init_params(kp, input_size, hidden_size, output_size)

    probs = perceptron_forward(x, w1, b1, w2, b2)
    probs = jax.block_until_ready(probs)

    # Reference mirrors the kernel math (bf16 MXU operands, f32 accum/epilogue,
    # eval-mode dropout == identity, exact softmax normalization).
    x2d = x.reshape(B, -1)
    h_ref = jnp.dot(x2d.astype(jnp.bfloat16), w1.astype(jnp.bfloat16),
                    preferred_element_type=jnp.float32) + b1
    h_ref = jnp.maximum(h_ref, 0.0)
    logits_ref = jnp.dot(h_ref.astype(jnp.bfloat16), w2.astype(jnp.bfloat16),
                         preferred_element_type=jnp.float32) + b2
    ref = jax.nn.softmax(logits_ref, axis=1)

    assert probs.shape == (B, output_size)
    assert jnp.allclose(probs, ref, atol=2e-3, rtol=2e-3)
    assert jnp.allclose(jnp.sum(probs, axis=1), 1.0, atol=1e-3)

    print("KERNEL_OK")
</pallas_src>

<mosaic_0001>
module attributes {stable_mosaic.version = 11 : i64} {
  func.func @perceptron_kernel(%arg0: i32, %arg1: memref<8x1024xf32, #tpu.memory_space<vmem>>, %arg2: memref<1024x128xbf16, #tpu.memory_space<vmem>>, %arg3: memref<1x128xf32, #tpu.memory_space<vmem>>, %arg4: memref<128x128xbf16, #tpu.memory_space<vmem>>, %arg5: memref<1x128xf32, #tpu.memory_space<vmem>>, %arg6: memref<8x128xf32, #tpu.memory_space<vmem>>) attributes {dimension_semantics = [#tpu.dimension_semantics<parallel>], iteration_bounds = array<i64: 1>, scalar_prefetch = 0 : i64, scratch_operands = 0 : i64, tpu.core_type = #tpu.core_type<tc>, window_params = [{transform_indices = @transform_0, window_bounds = array<i64: 8, 1024>}, {pipeline_mode = #tpu.pipeline_mode<synchronous>, transform_indices = @transform_1, window_bounds = array<i64: 1024, 128>}, {pipeline_mode = #tpu.pipeline_mode<synchronous>, transform_indices = @transform_2, window_bounds = array<i64: 1, 128>}, {pipeline_mode = #tpu.pipeline_mode<synchronous>, transform_indices = @transform_3, window_bounds = array<i64: 128, 128>}, {pipeline_mode = #tpu.pipeline_mode<synchronous>, transform_indices = @transform_4, window_bounds = array<i64: 1, 128>}, {transform_indices = @transform_5, window_bounds = array<i64: 8, 128>}]} {
    %c0 = arith.constant 0 : index
    %c0_0 = arith.constant 0 : index
    %0 = vector.load %arg1[%c0, %c0_0] : memref<8x1024xf32, #tpu.memory_space<vmem>>, vector<8x1024xf32>
    %1 = arith.truncf %0 : vector<8x1024xf32> to vector<8x1024xbf16>
    %c0_1 = arith.constant 0 : index
    %c0_2 = arith.constant 0 : index
    %2 = vector.load %arg2[%c0_1, %c0_2] : memref<1024x128xbf16, #tpu.memory_space<vmem>>, vector<1024x128xbf16>
    %cst = arith.constant dense<0.000000e+00> : vector<8x128xf32>
    %3 = tpu.matmul %1, %2, %cst {dimension_numbers = #tpu.dot_dimension_numbers<[1], [0], [0], [1], [0, 0, 1, 1], [], []>} : vector<8x1024xbf16>, vector<1024x128xbf16>, vector<8x128xf32> -> vector<8x128xf32>
    %c0_3 = arith.constant 0 : index
    %c0_4 = arith.constant 0 : index
    %4 = vector.load %arg3[%c0_3, %c0_4] : memref<1x128xf32, #tpu.memory_space<vmem>>, vector<1x128xf32>
    %5 = vector.broadcast %4 : vector<1x128xf32> to vector<8x128xf32>
    %6 = arith.addf %3, %5 : vector<8x128xf32>
    %cst_5 = arith.constant 0.000000e+00 : f32
    %7 = vector.broadcast %cst_5 : f32 to vector<8x128xf32>
    %8 = arith.maximumf %6, %7 : vector<8x128xf32>
    %9 = arith.truncf %8 : vector<8x128xf32> to vector<8x128xbf16>
    %c0_6 = arith.constant 0 : index
    %c0_7 = arith.constant 0 : index
    %10 = vector.load %arg4[%c0_6, %c0_7] : memref<128x128xbf16, #tpu.memory_space<vmem>>, vector<128x128xbf16>
    %cst_8 = arith.constant dense<0.000000e+00> : vector<8x128xf32>
    %11 = tpu.matmul %9, %10, %cst_8 {dimension_numbers = #tpu.dot_dimension_numbers<[1], [0], [0], [1], [0, 0, 1, 1], [], []>} : vector<8x128xbf16>, vector<128x128xbf16>, vector<8x128xf32> -> vector<8x128xf32>
    %c0_9 = arith.constant 0 : index
    %c0_10 = arith.constant 0 : index
    %12 = vector.load %arg5[%c0_9, %c0_10] : memref<1x128xf32, #tpu.memory_space<vmem>>, vector<1x128xf32>
    %13 = vector.broadcast %12 : vector<1x128xf32> to vector<8x128xf32>
    %14 = arith.addf %11, %13 : vector<8x128xf32>
    %cst_11 = arith.constant dense<0xFF800000> : vector<8xf32>
    %15 = vector.multi_reduction <maximumf>, %14, %cst_11 [1] : vector<8x128xf32> to vector<8xf32>
    %16 = vector.shape_cast %15 : vector<8xf32> to vector<8x1xf32>
    %17 = vector.broadcast %16 : vector<8x1xf32> to vector<8x128xf32>
    %18 = arith.subf %14, %17 : vector<8x128xf32>
    %19 = math.exp %18 : vector<8x128xf32>
    %cst_12 = arith.constant dense<0.000000e+00> : vector<8xf32>
    %20 = vector.multi_reduction <add>, %19, %cst_12 [1] : vector<8x128xf32> to vector<8xf32>
    %21 = vector.shape_cast %20 : vector<8xf32> to vector<8x1xf32>
    %22 = vector.broadcast %21 : vector<8x1xf32> to vector<8x128xf32>
    %23 = arith.divf %19, %22 : vector<8x128xf32>
    %c0_13 = arith.constant 0 : index
    %c0_14 = arith.constant 0 : index
    %24 = vector.load %arg6[%c0_13, %c0_14] : memref<8x128xf32, #tpu.memory_space<vmem>>, vector<8x128xf32>
    tpu.vector_store %arg6[%c0_13, %c0_14], %23 {strides = array<i32>} : memref<8x128xf32, #tpu.memory_space<vmem>>, vector<8x128xf32>,
    return
  }
  func.func @transform_0(%arg0: i32) -> (i32, i32) {
    %c0_i32 = arith.constant 0 : i32
    %c0_i32_0 = arith.constant 0 : i32
    return %arg0, %c0_i32 : i32, i32
  }
  func.func @transform_1(%arg0: i32) -> (i32, i32) {
    %c0_i32 = arith.constant 0 : i32
    %c0_i32_0 = arith.constant 0 : i32
    %c0_i32_1 = arith.constant 0 : i32
    return %c0_i32, %c0_i32_0 : i32, i32
  }
  func.func @transform_2(%arg0: i32) -> (i32, i32) {
    %c0_i32 = arith.constant 0 : i32
    %c0_i32_0 = arith.constant 0 : i32
    %c0_i32_1 = arith.constant 0 : i32
    return %c0_i32, %c0_i32_0 : i32, i32
  }
  func.func @transform_3(%arg0: i32) -> (i32, i32) {
    %c0_i32 = arith.constant 0 : i32
    %c0_i32_0 = arith.constant 0 : i32
    %c0_i32_1 = arith.constant 0 : i32
    return %c0_i32, %c0_i32_0 : i32, i32
  }
  func.func @transform_4(%arg0: i32) -> (i32, i32) {
    %c0_i32 = arith.constant 0 : i32
    %c0_i32_0 = arith.constant 0 : i32
    %c0_i32_1 = arith.constant 0 : i32
    return %c0_i32, %c0_i32_0 : i32, i32
  }
  func.func @transform_5(%arg0: i32) -> (i32, i32) {
    %c0_i32 = arith.constant 0 : i32
    %c0_i32_0 = arith.constant 0 : i32
    return %arg0, %c0_i32 : i32, i32
  }
}

</mosaic_0001>

<bundles_post_ra>
// kernel: tpu_custom_call.1
= control target key start
LH: loop header
LB: loop body
LE: loop exit
PB: predicated region body
PF: predicated region fallthrough
CT: control target
= control target key end

     0   :  { %10 = vsyncpa [#allocation3], 0  ;;  %s1312_s0 = inlined_call_operand.hbm [shape: f32[8,1024], index: 0, kind: input, shape index: {}]   ;;  %s1313_s1 = inlined_call_operand.hbm [shape: bf16[1024,128], index: 1, kind: input, shape index: {}]   ;;  %s1314_s2 = inlined_call_operand.vmem [shape: f32[1,128], index: 2, kind: input, shape index: {}]   ;;  %s1315_s3 = inlined_call_operand.hbm [shape: bf16[128,128], index: 3, kind: input, shape index: {}]   ;;  %s1316_s4 = inlined_call_operand.vmem [shape: f32[1,128], index: 4, kind: input, shape index: {}]   ;;  %s1317_s5 = inlined_call_operand.hbm [shape: f32[8,128], index: 5, kind: output, shape index: {}]  }
   0x1   :  { %11 = vsyncpa [#allocation6], 0 }
   0x2   :  { %12 = vsyncpa [#allocation4], 0  ;;  %s1256_s18 = smov [#allocation5]  }
   0x3   :  { %s28_s19 = sshll.u32 %s1256_s18, 4  ;;  %s29_s19 = int_to_ptr.vmem [resolvable:$true] %s28_s19 }
   0x4   :  { %s1178_s20 = scalar_lea.vmem %s29_s19, 8192  ;;  %p1183_p1 = scmp.lt.s32.totalorder %s29_s19, %s29_s19 }
   0x5   :  { %p1179_p0 = scmp.ne.s32.totalorder %s29_s19, %s1178_s20  ;;  %p1184_p2 = scmp.lt.s32.totalorder %s1178_s20, %s1178_s20 }
   0x7   :  { %p1185_p3 = por %p1184_p2, %p1183_p1 }
   0x9   :  { %p1186_p4 = pnand %p1185_p3, %p1179_p0 }
   0xb   :  { %1189 = shalt.err (!%p1186_p4)
}
   0xc   :  { %s1257_s21 = smov 64   ;;  %s1258_s22 = smov 4  }
   0xd   :  { %34 = dma.hbm_to_vmem [thread:$0]  %s1313_s1, 8192, %s29_s19, [#allocation6], %s1257_s21, %s1257_s21, %s1258_s22  }
   0xe   :  { %s1259_s25 = smov [#allocation2]   ;;  %s1260_s27 = smov [#allocation7]  }
   0xf   :  { %s19_s26 = sshll.u32 %s1259_s25, 4  ;;  %s42_s28 = sshll.u32 %s1260_s27, 4  ;;  %s20_s26 = int_to_ptr.vmem [resolvable:$true] %s19_s26  ;;  %s43_s28 = int_to_ptr.vmem [resolvable:$true] %s42_s28 }
  0x10   :  { %s1198_s29 = scalar_lea.vmem %s20_s26, 1024  ;;  %p1203_p6 = scmp.lt.s32.totalorder %s20_s26, %s20_s26 }
  0x11   :  { %p1199_p5 = scmp.ne.s32.totalorder %s20_s26, %s1198_s29  ;;  %p1204_p7 = scmp.lt.s32.totalorder %s1198_s29, %s1198_s29 }
  0x13   :  { %p1205_p8 = por %p1204_p7, %p1203_p6 }
  0x15   :  { %p1206_p9 = pnand %p1205_p8, %p1199_p5 }
  0x17   :  { %1209 = shalt.err (!%p1206_p9)
}
  0x18   :  { %22 = dma.hbm_to_vmem [thread:$0]  %s1312_s0, 1024, %s20_s26, [#allocation3]  }
  0x19   :  { %s1218_s7 = scalar_lea.vmem %s43_s28, 1024  ;;  %p1223_p11 = scmp.lt.s32.totalorder %s43_s28, %s43_s28 }
  0x1a   :  { %p1219_p10 = scmp.ne.s32.totalorder %s43_s28, %s1218_s7  ;;  %p1224_p12 = scmp.lt.s32.totalorder %s1218_s7, %s1218_s7 }
  0x1c   :  { %p1225_p13 = por %p1224_p12, %p1223_p11 }
  0x1e   :  { %p1226_p0 = pnand %p1225_p13, %p1219_p10 }
  0x20   :  { %1229 = shalt.err (!%p1226_p0)
}
  0x21   :  { %48 = dma.hbm_to_vmem [thread:$0]  %s1315_s3, 1024, %s43_s28, [#allocation6], %s1257_s21, %s1257_s21, %s1258_s22  }
  0x22   :  { %1250 = dma.done.wait [#allocation3], 1024  }
  0x23   :  { %1251 = vsyncadd [#allocation3], 4294966272 }
  0x24   :  { %1252 = dma.done.wait [#allocation6], 9216  }
  0x25   :  { %1253 = vsyncadd [#allocation6], 4294958080  ;;  %v1094_v0 = vld [vmem:[#allocation5 + $0x78] sm:$0xff]   ;;  %v1098_v4 = vld [vmem:[#allocation5 + $0x70] sm:$0xff]   ;;  %vm1262_vm0 = vmmov 0   ;;  %s1263_s10 = smov [#allocation8]  }
  0x26   :  { %v1095_v1 = vld [vmem:[#allocation5 + $0xf8] sm:$0xff]   ;;  %969 = vmatprep.subr.bf16.mxu0 %v1094_v0  ;;  %v1099_v5 = vld [vmem:[#allocation5 + $0xf0] sm:$0xff]   ;;  %v1102_v8 = vld [vmem:[#allocation5 + $0x68] sm:$0xff]   ;;  %s885_s11 = sshll.u32 %s1263_s10, 4  ;;  %s886_s11 = int_to_ptr.vmem [resolvable:$true] %s885_s11 }
  0x27   :  { %v1096_v2 = vld [vmem:[#allocation5 + $0x38] sm:$0xff]   ;;  %991 = vmatprep.subr.bf16.mxu1 %v1095_v1  ;;  %v1100_v6 = vld [vmem:[#allocation5 + $0x30] sm:$0xff]   ;;  %v1103_v9 = vld [vmem:[#allocation5 + $0xe8] sm:$0xff]   ;;  %p1235_p2 = scmp.lt.s32.totalorder %s886_s11, %s886_s11 }
  0x28   :  { %v1097_v3 = vld [vmem:[#allocation5 + $0xb8] sm:$0xff]   ;;  %970 = vmatpush3.bf16.msra.mxu0 %v1096_v2  ;;  %v1101_v7 = vld [vmem:[#allocation5 + $0xb0] sm:$0xff]   ;;  %v1104_v10 = vld [vmem:[#allocation5 + $0x28] sm:$0xff]  }
  0x29   :  { %992 = vmatpush3.bf16.msra.mxu1 %v1097_v3  ;;  %971 = vmatprep.subr.bf16.mxu0 %v1098_v4  ;;  %v1105_v11 = vld [vmem:[#allocation5 + $0xa8] sm:$0xff]   ;;  %v1106_v12 = vld [vmem:[#allocation5 + $0x60] sm:$0xff]   ;;  %v1110_v16 = vld [vmem:[#allocation5 + $0x58] sm:$0xff]  }
  0x2a   :  { %993 = vmatprep.subr.bf16.mxu1 %v1099_v5  ;;  %v1107_v13 = vld [vmem:[#allocation5 + $0xe0] sm:$0xff]   ;;  %v1111_v17 = vld [vmem:[#allocation5 + $0xd8] sm:$0xff]   ;;  %v1114_v20 = vld [vmem:[#allocation5 + $0x50] sm:$0xff]  }
  0x2b   :  { %v1108_v14 = vld [vmem:[#allocation5 + $0x20] sm:$0xff]   ;;  %v1112_v18 = vld [vmem:[#allocation5 + $0x18] sm:$0xff]   ;;  %v1115_v21 = vld [vmem:[#allocation5 + $0xd0] sm:$0xff]  }
  0x2c   :  { %972 = vmatpush3.bf16.msra.mxu0 %v1100_v6  ;;  %v1109_v15 = vld [vmem:[#allocation5 + $0xa0] sm:$0xff]   ;;  %v1113_v19 = vld [vmem:[#allocation5 + $0x98] sm:$0xff]   ;;  %v1116_v22 = vld [vmem:[#allocation5 + $0x10] sm:$0xff]  }
  0x2d   :  { %994 = vmatpush3.bf16.msra.mxu1 %v1101_v7  ;;  %973 = vmatprep.subr.bf16.mxu0 %v1102_v8  ;;  %v1117_v23 = vld [vmem:[#allocation5 + $0x90] sm:$0xff]   ;;  %v1118_v24 = vld [vmem:[#allocation5 + $0x48] sm:$0xff]   ;;  %v1122_v28 = vld [vmem:[#allocation5 + $0x40] sm:$0xff]  }
  0x2e   :  { %995 = vmatprep.subr.bf16.mxu1 %v1103_v9  ;;  %v1119_v25 = vld [vmem:[#allocation5 + $0xc8] sm:$0xff]   ;;  %v1123_v29 = vld [vmem:[#allocation5 + $0xc0] sm:$0xff]   ;;  %v64_v33 = vld [vmem:[#allocation2 + $0x18] sm:$0xff] }
  0x2f   :  { %v1120_v26 = vld [vmem:[#allocation5 + $0x8] sm:$0xff]   ;;  %v1124_v30 = vld [vmem:[#allocation5] sm:$0xff]   ;;  %v72_v36 = vpack.c.bf16 %v64_v33, %v64_v33  ;;  %v63_v38 = vld [vmem:[#allocation2 + $0x10] sm:$0xff] }
  0x30   :  { %974 = vmatpush3.bf16.msra.mxu0 %v1104_v10  ;;  %v1121_v27 = vld [vmem:[#allocation5 + $0x88] sm:$0xff]   ;;  %v1125_v31 = vld [vmem:[#allocation5 + $0x80] sm:$0xff]   ;;  %v71_v39 = vpack.c.bf16 %v63_v38, %v63_v38  ;;  %v1126_v40 = vld [vmem:[#allocation5 + $0x178] sm:$0xff]  }
  0x31   :  { %996 = vmatpush3.bf16.msra.mxu1 %v1105_v11  ;;  %975 = vmatprep.subr.bf16.mxu0 %v1106_v12  ;;  %v62_v32 = vld [vmem:[#allocation2 + $0x8] sm:$0xff]  ;;  %v61_v34 = vld [vmem:[#allocation2] sm:$0xff]  ;;  %v1127_v41 = vld [vmem:[#allocation5 + $0x1f8] sm:$0xff]  }
  0x32   :  { %997 = vmatprep.subr.bf16.mxu1 %v1107_v13  ;;  %v70_v35 = vpack.c.bf16 %v62_v32, %v62_v32  ;;  %v69_v37 = vpack.c.bf16 %v61_v34, %v61_v34  ;;  %668 = vmatprep.mubr.bf16.mxu1 %v72_v36  ;;  %v1128_v42 = vld [vmem:[#allocation5 + $0x138] sm:$0xff]   ;;  %v1130_v44 = vld [vmem:[#allocation5 + $0x170] sm:$0xff]   ;;  %v1134_v48 = vld [vmem:[#allocation5 + $0x168] sm:$0xff]  }
  0x33   :  { %v1129_v43 = vld [vmem:[#allocation5 + $0x1b8] sm:$0xff]   ;;  %v1131_v45 = vld [vmem:[#allocation5 + $0x1f0] sm:$0xff]   ;;  %v1135_v49 = vld [vmem:[#allocation5 + $0x1e8] sm:$0xff]  }
  0x34   :  { %976 = vmatpush3.bf16.msra.mxu0 %v1108_v14  ;;  %628 = vmatprep.mubr.bf16.mxu0 %v70_v35  ;;  %v1132_v46 = vld [vmem:[#allocation5 + $0x130] sm:$0xff]   ;;  %v1136_v50 = vld [vmem:[#allocation5 + $0x128] sm:$0xff]   ;;  %v1138_v52 = vld [vmem:[#allocation5 + $0x160] sm:$0xff]  }
  0x35   :  { %998 = vmatpush3.bf16.msra.mxu1 %v1109_v15  ;;  %977 = vmatprep.subr.bf16.mxu0 %v1110_v16  ;;  %v1133_v47 = vld [vmem:[#allocation5 + $0x1b0] sm:$0xff]   ;;  %v1137_v51 = vld [vmem:[#allocation5 + $0x1a8] sm:$0xff]   ;;  %v1139_v53 = vld [vmem:[#allocation5 + $0x1e0] sm:$0xff]  }
  0x36   :  { %999 = vmatprep.subr.bf16.mxu1 %v1111_v17  ;;  %v1140_v54 = vld [vmem:[#allocation5 + $0x120] sm:$0xff]   ;;  %v1142_v56 = vld [vmem:[#allocation5 + $0x158] sm:$0xff]   ;;  %v1146_v60 = vld [vmem:[#allocation5 + $0x150] sm:$0xff]   ;;  %v1261_v17 = vmov 0.0  }
  0x37   :  { %v1141_v55 = vld [vmem:[#allocation5 + $0x1a0] sm:$0xff]   ;;  %v1143_v57 = vld [vmem:[#allocation5 + $0x1d8] sm:$0xff]   ;;  %v1147_v61 = vld [vmem:[#allocation5 + $0x1d0] sm:$0xff]  }
  0x38   :  { %978 = vmatpush3.bf16.msra.mxu0 %v1112_v18  ;;  %v1144_v58 = vld [vmem:[#allocation5 + $0x118] sm:$0xff]   ;;  %v1148_v62 = vld [vmem:[#allocation5 + $0x110] sm:$0xff]   ;;  %v1150_v0 = vld [vmem:[#allocation5 + $0x148] sm:$0xff]  }
  0x39   :  { %1000 = vmatpush3.bf16.msra.mxu1 %v1113_v19  ;;  %979 = vmatprep.subr.bf16.mxu0 %v1114_v20  ;;  %v1145_v59 = vld [vmem:[#allocation5 + $0x198] sm:$0xff]   ;;  %v1149_v63 = vld [vmem:[#allocation5 + $0x190] sm:$0xff]   ;;  %v1151_v1 = vld [vmem:[#allocation5 + $0x1c8] sm:$0xff]  }
  0x3a   :  { %1001 = vmatprep.subr.bf16.mxu1 %v1115_v21  ;;  %v1152_v2 = vld [vmem:[#allocation5 + $0x108] sm:$0xff]   ;;  %v1154_v4 = vld [vmem:[#allocation5 + $0x140] sm:$0xff]   ;;  %v68_v9 = vld [vmem:[#allocation2 + $0x38] sm:$0xff] }
  0x3b   :  { %v1153_v3 = vld [vmem:[#allocation5 + $0x188] sm:$0xff]   ;;  %v1155_v5 = vld [vmem:[#allocation5 + $0x1c0] sm:$0xff]   ;;  %v76_v11 = vpack.c.bf16 %v68_v9, %v68_v9  ;;  %v67_v13 = vld [vmem:[#allocation2 + $0x30] sm:$0xff] }
  0x3c   :  { %980 = vmatpush3.bf16.msra.mxu0 %v1116_v22  ;;  %v1156_v6 = vld [vmem:[#allocation5 + $0x100] sm:$0xff]   ;;  %v66_v8 = vld [vmem:[#allocation2 + $0x28] sm:$0xff]  ;;  %v75_v15 = vpack.c.bf16 %v67_v13, %v67_v13  ;;  %v1158_v16 = vld [vmem:[#allocation7 + $0x38] sm:$0xff]  }
  0x3d   :  { %1002 = vmatpush3.bf16.msra.mxu1 %v1117_v23  ;;  %981 = vmatprep.subr.bf16.mxu0 %v1118_v24  ;;  %v1157_v7 = vld [vmem:[#allocation5 + $0x180] sm:$0xff]   ;;  %v74_v10 = vpack.c.bf16 %v66_v8, %v66_v8  ;;  %v1159_v18 = vld [vmem:[#allocation7 + $0x30] sm:$0xff]   ;;  %v1160_v19 = vld [vmem:[#allocation7 + $0x28] sm:$0xff]  }
  0x3e   :  { %1003 = vmatprep.subr.bf16.mxu1 %v1119_v25  ;;  %v65_v12 = vld [vmem:[#allocation2 + $0x20] sm:$0xff]  ;;  %v1162_v21 = vld [vmem:[#allocation7 + $0x18] sm:$0xff]   ;;  %v1163_v22 = vld [vmem:[#allocation7 + $0x10] sm:$0xff]  }
  0x3f   :  { %v73_v14 = vpack.c.bf16 %v65_v12, %v65_v12  ;;  %v1161_v20 = vld [vmem:[#allocation7 + $0x20] sm:$0xff]   ;;  %v1164_v23 = vld [vmem:[#allocation7 + $0x8] sm:$0xff]  }
  0x40   :  { %982 = vmatpush3.bf16.msra.mxu0 %v1120_v26  ;;  %v1165_v24 = vld [vmem:[#allocation7] sm:$0xff]  }
  0x41   :  { %1004 = vmatpush3.bf16.msra.mxu1 %v1121_v27  ;;  %983 = vmatprep.subr.bf16.mxu0 %v1122_v28  ;;  %v895_v34 = vld [vmem:[%s1314_s2] ss:$0 sm:$0xff] }
  0x42   :  { %1005 = vmatprep.subr.bf16.mxu1 %v1123_v29 }
  0x44   :  { %984 = vmatpush3.bf16.msra.mxu0 %v1124_v30 }
  0x45   :  { %1006 = vmatpush3.bf16.msra.mxu1 %v1125_v31  ;;  %1013 = vmatprep.subr.bf16.mxu0 %v1126_v40 }
  0x46   :  { %1035 = vmatprep.subr.bf16.mxu1 %v1127_v41 }
  0x47   :  { %629 = vmatmul.mubr.bf16.vlgmr.msra.gmra.mxu0 %v69_v37 }
  0x48   :  { %669 = vmatmul.mubr.bf16.vlgmr.msra.gmra.mxu1 %v71_v39  ;;  %1014 = vmatpush3.bf16.msra.mxu0 %v1128_v42 }
  0x49   :  { %1036 = vmatpush3.bf16.msra.mxu1 %v1129_v43  ;;  %1015 = vmatprep.subr.bf16.mxu0 %v1130_v44 }
  0x4a   :  { %1037 = vmatprep.subr.bf16.mxu1 %v1131_v45  ;;  %708 = vmatprep.mubr.bf16.mxu0 %v74_v10 }
  0x4b   :  { %748 = vmatprep.mubr.bf16.mxu1 %v76_v11 }
  0x4c   :  { %1016 = vmatpush3.bf16.msra.mxu0 %v1132_v46 }
  0x4d   :  { %1038 = vmatpush3.bf16.msra.mxu1 %v1133_v47  ;;  %1017 = vmatprep.subr.bf16.mxu0 %v1134_v48 }
  0x4e   :  { %1039 = vmatprep.subr.bf16.mxu1 %v1135_v49 }
  0x50   :  { %1018 = vmatpush3.bf16.msra.mxu0 %v1136_v50 }
  0x51   :  { %1040 = vmatpush3.bf16.msra.mxu1 %v1137_v51  ;;  %1019 = vmatprep.subr.bf16.mxu0 %v1138_v52  ;;  %v960_v52 = vld [vmem:[%s1316_s4] ss:$0 sm:$0xff]  ;;  %s1230_s4 = scalar_lea.vmem %s886_s11, 128 }
  0x52   :  { %1041 = vmatprep.subr.bf16.mxu1 %v1139_v53  ;;  %p1231_p1 = scmp.ne.s32.totalorder %s886_s11, %s1230_s4  ;;  %p1236_p3 = scmp.lt.s32.totalorder %s1230_s4, %s1230_s4 }
  0x54   :  { %1020 = vmatpush3.bf16.msra.mxu0 %v1140_v54  ;;  %p1237_p4 = por %p1236_p3, %p1235_p2 }
  0x55   :  { %1042 = vmatpush3.bf16.msra.mxu1 %v1141_v55  ;;  %1021 = vmatprep.subr.bf16.mxu0 %v1142_v56 }
  0x56   :  { %1043 = vmatprep.subr.bf16.mxu1 %v1143_v57  ;;  %p1238_p5 = pnand %p1237_p4, %p1231_p1 }
  0x58   :  { %1022 = vmatpush3.bf16.msra.mxu0 %v1144_v58 }
  0x59   :  { %1044 = vmatpush3.bf16.msra.mxu1 %v1145_v59  ;;  %1023 = vmatprep.subr.bf16.mxu0 %v1146_v60 }
  0x5a   :  { %1045 = vmatprep.subr.bf16.mxu1 %v1147_v61 }
  0x5c   :  { %1024 = vmatpush3.bf16.msra.mxu0 %v1148_v62 }
  0x5d   :  { %1046 = vmatpush3.bf16.msra.mxu1 %v1149_v63  ;;  %1025 = vmatprep.subr.bf16.mxu0 %v1150_v0 }
  0x5e   :  { %1047 = vmatprep.subr.bf16.mxu1 %v1151_v1 }
  0x60   :  { %1026 = vmatpush3.bf16.msra.mxu0 %v1152_v2 }
  0x61   :  { %1048 = vmatpush3.bf16.msra.mxu1 %v1153_v3  ;;  %1027 = vmatprep.subr.bf16.mxu0 %v1154_v4 }
  0x62   :  { %1049 = vmatprep.subr.bf16.mxu1 %v1155_v5 }
  0x64   :  { %1028 = vmatpush3.bf16.msra.mxu0 %v1156_v6 }
  0x65   :  { %1050 = vmatpush3.bf16.msra.mxu1 %v1157_v7  ;;  %1066 = vmatprep.subr.bf16.mxu0 %v1261_v17 }
  0x67   :  { %709 = vmatmul.mubr.bf16.vlgmr.msra.gmra.mxu0 %v73_v14 }
  0x68   :  { %749 = vmatmul.mubr.bf16.vlgmr.msra.gmra.mxu1 %v75_v15  ;;  %1067 = vmatpush3.bf16.msra.mxu0 %v1158_v16 }
  0x69   :  { %1068 = vmatprep.subr.bf16.mxu0 %v1261_v17  ;;  %1082 = vmatprep.mubr.msk.bf16.mxu0 %vm1262_vm0, %v1261_v17 }
  0x6c   :  { %1069 = vmatpush3.bf16.msra.mxu0 %v1159_v18 }
  0x6d   :  { %1070 = vmatprep.subr.bf16.mxu0 %v1261_v17 }
  0x70   :  { %1071 = vmatpush3.bf16.msra.mxu0 %v1160_v19 }
  0x71   :  { %1072 = vmatprep.subr.bf16.mxu0 %v1261_v17 }
  0x74   :  { %1073 = vmatpush3.bf16.msra.mxu0 %v1161_v20 }
  0x75   :  { %1074 = vmatprep.subr.bf16.mxu0 %v1261_v17 }
  0x78   :  { %1075 = vmatpush3.bf16.msra.mxu0 %v1162_v21 }
  0x79   :  { %1076 = vmatprep.subr.bf16.mxu0 %v1261_v17 }
  0x7c   :  { %1077 = vmatpush3.bf16.msra.mxu0 %v1163_v22 }
  0x7d   :  { %1078 = vmatprep.subr.bf16.mxu0 %v1261_v17 }
  0x80   :  { %1079 = vmatpush3.bf16.msra.mxu0 %v1164_v23 }
  0x81   :  { %1080 = vmatprep.subr.bf16.mxu0 %v1261_v17 }
  0x84   :  { %1081 = vmatpush3.bf16.msra.mxu0 %v1165_v24 }
 0x107   :  { %v985_v25 = vpop.f32.mrf.mxu0 }
 0x108   :  { %v1007_v26 = vpop.f32.mrf.mxu1 }
 0x109   :  { %v986_v27 = vpop.f32.mrf.mxu0 }
 0x10a   :  { %v1008_v28 = vpop.f32.mrf.mxu1  ;;  %v987_v33 = vadd.f32 %v986_v27, %v985_v25 }
 0x10b   :  { %v988_v29 = vpop.f32.mrf.mxu0  ;;  %v1009_v36 = vadd.f32 %v1008_v28, %v1007_v26 }
 0x10c   :  { %v1010_v30 = vpop.f32.mrf.mxu1  ;;  %v631_v35 = vadd.f32 %v987_v33, %v895_v34 }
 0x10d   :  { %v989_v31 = vpop.f32.mrf.mxu0 }
 0x10e   :  { %v1011_v32 = vpop.f32.mrf.mxu1  ;;  %v671_v40 = vadd.f32 %v1009_v36, %v631_v35 }
 0x127   :  { %v1029_v37 = vpop.f32.mrf.mxu0 }
 0x128   :  { %v1051_v38 = vpop.f32.mrf.mxu1 }
 0x129   :  { %v1030_v39 = vpop.f32.mrf.mxu0 }
 0x12a   :  { %v1031_v41 = vadd.f32 %v1030_v39, %v1029_v37  ;;  %v1052_v42 = vpop.f32.mrf.mxu1 }
 0x12b   :  { %v1032_v43 = vpop.f32.mrf.mxu0  ;;  %v1053_v45 = vadd.f32 %v1052_v42, %v1051_v38 }
 0x12c   :  { %v711_v44 = vadd.f32 %v1031_v41, %v671_v40  ;;  %v1054_v46 = vpop.f32.mrf.mxu1 }
 0x12d   :  { %v1033_v47 = vpop.f32.mrf.mxu0 }
 0x12e   :  { %v751_v48 = vadd.f32 %v1053_v45, %v711_v44  ;;  %v1055_v49 = vpop.f32.mrf.mxu1 }
 0x130   :  { %v756_v50 = vmax.f32 %v751_v48, 0.0 }
 0x132   :  { %v757_v51 = vpack.c.bf16 %v756_v50, %v756_v50 }
 0x134   :  { %1083 = vmatmul.mubr.bf16.vlgmr.msra.gmra.mxu0 %v757_v51 }
 0x1f4   :  { %v863_v53 = vpop.f32.mrf.mxu0 }
 0x1f5   :  { %v864_v54 = vadd.f32 %v960_v52, %v863_v53 }
 0x1f6   :  { %v1084_v55 = vpop.f32.mrf.mxu0 }
 0x1f7   :  { %869 = vmax.xlane.f32.xlu0 %v864_v54 }
 0x1f8   :  { %v866_v56 = vpop.f32.mrf.mxu0 }
 0x1fa   :  { %v1085_v57 = vpop.f32.mrf.mxu0 }
 0x280   :  { %v870_v58 = vpop.xlane.xlu0 %869 }
 0x281   :  { %v871_v59 = vsub.f32 %v864_v54, %v870_v58 }
 0x283   :  { %v872_v60 = vmul.f32 1.442695, %v871_v59 }
 0x285   :  { %1166 = vpow2.f32 %v872_v60 }
 0x292   :  { %v1167_v61 = vpop.eup %1166 }
 0x293   :  { %874 = vadd.xlane.f32.xlu0 %v1167_v61 }
 0x31c   :  { %v875_v62 = vpop.xlane.xlu0 %874 }
 0x31d   :  { %1168 = vrcp.f32 %v875_v62 }
 0x32a   :  { %v1169_v63 = vpop.eup %1168 }
 0x32b   :  { %v877_v0 = vmul.f32 %v1169_v63, %v1167_v61 }
 0x32d   :  { %878 = vst [vmem:[#allocation8] sm:$0xff] %v877_v0 }
 0x32e   :  { %1241 = shalt.err (!%p1238_p5)
}
 0x32f   :  { %888 = dma.vmem_to_hbm [thread:$0]  %s886_s11, 128, %s1317_s5, [#allocation4]  }
 0x330   :  { %1254 = dma.done.wait [#allocation4], 128  }
 0x331   :  { %1255 = vsyncadd [#allocation4], 4294967168 }
 0x332   :  { %892 = vsyncpa [#allocation3], 1 }
 0x333   :  { %893 = vsyncpa [#allocation6], 1 }
 0x334   :  { %894 = vsyncpa [#allocation4], 1 }

</bundles_post_ra>
